<compile_context>
chip_gen: v7x
topology: tpu7x:2x2x1
jax: 0.10.0
libtpu: 0.0.40
codegen_flags: <defaults>
</compile_context>

<pallas_src>
import math

import jax
import jax.numpy as jnp
from jax.experimental import pallas as pl
from jax.experimental.pallas import tpu as pltpu

IN_FEATURES = 3     # linear  : 3 -> 9
HID_FEATURES = 9
OUT_FEATURES = 9    # linear2 : 9 -> 9  (see TODO above)

_LANE = 128
_DEFAULT_TILE_B = 32 * 1024            # ~1.5 MiB useful HBM bytes per grid step
_SMALL_BATCH_THRESHOLD = 4096          # below this, plain XLA is strictly cheaper
_DEFAULT_VMEM_LIMIT = 48 * 1024 * 1024 # safe on v7x (64 MiB), free on v5e/v6e


def _round_up(n, m):
    return ((n + m - 1) // m) * m


def _mlp_kernel(w1_ref, b1_ref, w2_ref, b2_ref, x_ref, o_ref):
    """Fused Linear -> ReLU -> Linear -> ReLU on a lane-dense (features, batch) tile.

    Per grid step:
      x_ref : (3, TB)   batch on the lane axis (full-lane loads/stores)
      o_ref : (9, TB)
    Weights/biases are pinned (same block every step) and stay resident in VMEM.
    Compute is f32 regardless of I/O dtype.
    """
    x = x_ref[...].astype(jnp.float32)                                 # (3, TB)
    h = jnp.dot(w1_ref[...], x, preferred_element_type=jnp.float32)    # (9, TB)
    h = jnp.maximum(h + b1_ref[...], 0.0)
    o = jnp.dot(w2_ref[...], h, preferred_element_type=jnp.float32)    # (9, TB)
    o = jnp.maximum(o + b2_ref[...], 0.0)
    o_ref[...] = o.astype(o_ref.dtype)


def mlp_forward_fm(xt, w1, b1, w2, b2, *, tile_b=_DEFAULT_TILE_B,
                   vmem_limit_bytes=_DEFAULT_VMEM_LIMIT):
    """Feature-major (zero-copy) entry point: xt (3, B) -> (9, B).

    No padding, no transposes: the ragged final batch tile is handled by
    Pallas's out-of-bounds masking (OOB input lanes read unspecified values,
    OOB output lanes are discarded), and each batch column is independent so
    garbage lanes never affect valid ones.
    """
    fin, B = xt.shape
    assert fin == IN_FEATURES
    if B == 0:
        return jnp.zeros((OUT_FEATURES, 0), xt.dtype)

    tb = min(_round_up(tile_b, _LANE), _round_up(B, _LANE))
    # v7x megacore: guarantee >= 2 grid steps whenever the batch is big enough
    # to split, otherwise one TensorCore idles on a single-program grid.
    if B >= 2 * _LANE and pl.cdiv(B, tb) < 2:
        tb = _round_up(pl.cdiv(B, 2), _LANE)
    grid = (pl.cdiv(B, tb),)

    b1_2d = b1.reshape(HID_FEATURES, 1).astype(jnp.float32)   # broadcasts over lanes
    b2_2d = b2.reshape(OUT_FEATURES, 1).astype(jnp.float32)

    return pl.pallas_call(
        _mlp_kernel,
        out_shape=jax.ShapeDtypeStruct((OUT_FEATURES, B), xt.dtype),
        grid=grid,
        in_specs=[
            pl.BlockSpec((HID_FEATURES, IN_FEATURES), lambda i: (0, 0)),   # w1 (9,3)
            pl.BlockSpec((HID_FEATURES, 1), lambda i: (0, 0)),             # b1 (9,1)
            pl.BlockSpec((OUT_FEATURES, HID_FEATURES), lambda i: (0, 0)),  # w2 (9,9)
            pl.BlockSpec((OUT_FEATURES, 1), lambda i: (0, 0)),             # b2 (9,1)
            pl.BlockSpec((IN_FEATURES, tb), lambda i: (0, i)),             # x tile
        ],
        out_specs=pl.BlockSpec((OUT_FEATURES, tb), lambda i: (0, i)),
        compiler_params=pltpu.CompilerParams(
            dimension_semantics=("parallel",),     # batch axis -> both TCs on v7x
            vmem_limit_bytes=vmem_limit_bytes,
        ),
    )(w1.astype(jnp.float32), b1_2d, w2.astype(jnp.float32), b2_2d, xt)


def _mlp_ref(x, w1, b1, w2, b2):
    """Plain-jnp reference; also the small-batch fast path (XLA fuses this)."""
    h = jnp.maximum(x.astype(jnp.float32) @ w1.T.astype(jnp.float32) + b1, 0.0)
    return jnp.maximum(h @ w2.T.astype(jnp.float32) + b2, 0.0)


def mlp_forward(x, w1, b1, w2, b2, *, tile_b=_DEFAULT_TILE_B,
                small_batch_threshold=_SMALL_BATCH_THRESHOLD,
                force_kernel=False, vmem_limit_bytes=_DEFAULT_VMEM_LIMIT):
    """PyTorch-semantics entry point: x (B, 3) -> (B, 9)."""
    B = x.shape[0]
    if B == 0:
        return jnp.zeros((0, OUT_FEATURES), x.dtype)
    if B < small_batch_threshold and not force_kernel:
        # Kernel launch / layout plumbing would dominate at this size.
        return _mlp_ref(x, w1, b1, w2, b2).astype(x.dtype)
    # Large batch: one transpose at each boundary.  Callers that can keep a
    # (features, batch) layout end-to-end should call mlp_forward_fm directly
    # and avoid these two extra HBM passes entirely.
    out_t = mlp_forward_fm(x.T, w1, b1, w2, b2, tile_b=tile_b,
                           vmem_limit_bytes=vmem_limit_bytes)
    return out_t.T


def _init_linear(key, in_f, out_f):
    """Deterministic PyTorch-style init: U(-1/sqrt(in_f), 1/sqrt(in_f))."""
    kw, kb = jax.random.split(key)
    bound = 1.0 / math.sqrt(in_f)
    w = jax.random.uniform(kw, (out_f, in_f), jnp.float32, -bound, bound)
    b = jax.random.uniform(kb, (out_f,), jnp.float32, -bound, bound)
    return w, b


if __name__ == "__main__":
    key = jax.random.PRNGKey(0)
    k_x, k_x2, k_x3, k_l1, k_l2 = jax.random.split(key, 5)

    w1, b1 = _init_linear(k_l1, IN_FEATURES, HID_FEATURES)    # linear : 3 -> 9
    w2, b2 = _init_linear(k_l2, HID_FEATURES, OUT_FEATURES)   # linear2: 9 -> 9

    # 1) Module-sized input (torch.randn(1, 3)-ish): small-batch jnp fast path.
    x = jax.random.normal(k_x, (2, IN_FEATURES), jnp.float32)
    out = jax.block_until_ready(mlp_forward(x, w1, b1, w2, b2))
    assert out.shape == (2, OUT_FEATURES)
    assert jnp.allclose(out, _mlp_ref(x, w1, b1, w2, b2), atol=1e-4, rtol=1e-4)

    # 2) Batch-major kernel path, forced: exercises the 2-step "parallel" grid
    #    (megacore tile split) and the ragged final tile (no HBM padding).
    x2 = jax.random.normal(k_x2, (300, IN_FEATURES), jnp.float32)
    out2 = jax.block_until_ready(
        mlp_forward(x2, w1, b1, w2, b2, force_kernel=True))
    assert out2.shape == (300, OUT_FEATURES)
    assert jnp.allclose(out2, _mlp_ref(x2, w1, b1, w2, b2), atol=1e-4, rtol=1e-4)

    # 3) Feature-major (zero-copy) kernel path: evenly tiled 3-step grid.
    x3t = jax.random.normal(k_x3, (IN_FEATURES, 384), jnp.float32)
    out3t = jax.block_until_ready(
        mlp_forward_fm(x3t, w1, b1, w2, b2, tile_b=128))
    assert out3t.shape == (OUT_FEATURES, 384)
    assert jnp.allclose(out3t.T, _mlp_ref(x3t.T, w1, b1, w2, b2),
                        atol=1e-4, rtol=1e-4)

    print("KERNEL_OK")
</pallas_src>

<mosaic_0001>
module attributes {stable_mosaic.version = 11 : i64} {
  func.func @_mlp_kernel(%arg0: i32, %arg1: memref<9x3xf32, #tpu.memory_space<vmem>>, %arg2: memref<9x1xf32, #tpu.memory_space<vmem>>, %arg3: memref<9x9xf32, #tpu.memory_space<vmem>>, %arg4: memref<9x1xf32, #tpu.memory_space<vmem>>, %arg5: memref<3x256xf32, #tpu.memory_space<vmem>>, %arg6: memref<9x256xf32, #tpu.memory_space<vmem>>) attributes {dimension_semantics = [#tpu.dimension_semantics<parallel>], iteration_bounds = array<i64: 2>, scalar_prefetch = 0 : i64, scratch_operands = 0 : i64, tpu.core_type = #tpu.core_type<tc>, window_params = [{pipeline_mode = #tpu.pipeline_mode<synchronous>, transform_indices = @transform_0, window_bounds = array<i64: 9, 3>}, {pipeline_mode = #tpu.pipeline_mode<synchronous>, transform_indices = @transform_1, window_bounds = array<i64: 9, 1>}, {pipeline_mode = #tpu.pipeline_mode<synchronous>, transform_indices = @transform_2, window_bounds = array<i64: 9, 9>}, {pipeline_mode = #tpu.pipeline_mode<synchronous>, transform_indices = @transform_3, window_bounds = array<i64: 9, 1>}, {transform_indices = @transform_4, window_bounds = array<i64: 3, 256>}, {transform_indices = @transform_5, window_bounds = array<i64: 9, 256>}]} {
    %c0 = arith.constant 0 : index
    %c0_0 = arith.constant 0 : index
    %0 = vector.load %arg5[%c0, %c0_0] : memref<3x256xf32, #tpu.memory_space<vmem>>, vector<3x256xf32>
    %c0_1 = arith.constant 0 : index
    %c0_2 = arith.constant 0 : index
    %1 = vector.load %arg1[%c0_1, %c0_2] : memref<9x3xf32, #tpu.memory_space<vmem>>, vector<9x3xf32>
    %cst = arith.constant dense<0.000000e+00> : vector<9x256xf32>
    %2 = tpu.matmul %1, %0, %cst {dimension_numbers = #tpu.dot_dimension_numbers<[1], [0], [0], [1], [0, 0, 1, 1], [], []>} : vector<9x3xf32>, vector<3x256xf32>, vector<9x256xf32> -> vector<9x256xf32>
    %c0_3 = arith.constant 0 : index
    %c0_4 = arith.constant 0 : index
    %3 = vector.load %arg2[%c0_3, %c0_4] : memref<9x1xf32, #tpu.memory_space<vmem>>, vector<9x1xf32>
    %4 = vector.broadcast %3 : vector<9x1xf32> to vector<9x256xf32>
    %5 = arith.addf %2, %4 : vector<9x256xf32>
    %cst_5 = arith.constant 0.000000e+00 : f32
    %6 = vector.broadcast %cst_5 : f32 to vector<9x256xf32>
    %7 = arith.maximumf %5, %6 : vector<9x256xf32>
    %c0_6 = arith.constant 0 : index
    %c0_7 = arith.constant 0 : index
    %8 = vector.load %arg3[%c0_6, %c0_7] : memref<9x9xf32, #tpu.memory_space<vmem>>, vector<9x9xf32>
    %cst_8 = arith.constant dense<0.000000e+00> : vector<9x256xf32>
    %9 = tpu.matmul %8, %7, %cst_8 {dimension_numbers = #tpu.dot_dimension_numbers<[1], [0], [0], [1], [0, 0, 1, 1], [], []>} : vector<9x9xf32>, vector<9x256xf32>, vector<9x256xf32> -> vector<9x256xf32>
    %c0_9 = arith.constant 0 : index
    %c0_10 = arith.constant 0 : index
    %10 = vector.load %arg4[%c0_9, %c0_10] : memref<9x1xf32, #tpu.memory_space<vmem>>, vector<9x1xf32>
    %11 = vector.broadcast %10 : vector<9x1xf32> to vector<9x256xf32>
    %12 = arith.addf %9, %11 : vector<9x256xf32>
    %cst_11 = arith.constant 0.000000e+00 : f32
    %13 = vector.broadcast %cst_11 : f32 to vector<9x256xf32>
    %14 = arith.maximumf %12, %13 : vector<9x256xf32>
    %c0_12 = arith.constant 0 : index
    %c0_13 = arith.constant 0 : index
    %15 = vector.load %arg6[%c0_12, %c0_13] : memref<9x256xf32, #tpu.memory_space<vmem>>, vector<9x256xf32>
    tpu.vector_store %arg6[%c0_12, %c0_13], %14 {strides = array<i32>} : memref<9x256xf32, #tpu.memory_space<vmem>>, vector<9x256xf32>,
    return
  }
  func.func @transform_0(%arg0: i32) -> (i32, i32) {
    %c0_i32 = arith.constant 0 : i32
    %c0_i32_0 = arith.constant 0 : i32
    %c0_i32_1 = arith.constant 0 : i32
    return %c0_i32, %c0_i32_0 : i32, i32
  }
  func.func @transform_1(%arg0: i32) -> (i32, i32) {
    %c0_i32 = arith.constant 0 : i32
    %c0_i32_0 = arith.constant 0 : i32
    %c0_i32_1 = arith.constant 0 : i32
    return %c0_i32, %c0_i32_0 : i32, i32
  }
  func.func @transform_2(%arg0: i32) -> (i32, i32) {
    %c0_i32 = arith.constant 0 : i32
    %c0_i32_0 = arith.constant 0 : i32
    %c0_i32_1 = arith.constant 0 : i32
    return %c0_i32, %c0_i32_0 : i32, i32
  }
  func.func @transform_3(%arg0: i32) -> (i32, i32) {
    %c0_i32 = arith.constant 0 : i32
    %c0_i32_0 = arith.constant 0 : i32
    %c0_i32_1 = arith.constant 0 : i32
    return %c0_i32, %c0_i32_0 : i32, i32
  }
  func.func @transform_4(%arg0: i32) -> (i32, i32) {
    %c0_i32 = arith.constant 0 : i32
    %c0_i32_0 = arith.constant 0 : i32
    return %c0_i32, %arg0 : i32, i32
  }
  func.func @transform_5(%arg0: i32) -> (i32, i32) {
    %c0_i32 = arith.constant 0 : i32
    %c0_i32_0 = arith.constant 0 : i32
    return %c0_i32, %arg0 : i32, i32
  }
}

</mosaic_0001>

<bundles_post_ra>
// kernel: tpu_custom_call.1
= control target key start
LH: loop header
LB: loop body
LE: loop exit
PB: predicated region body
PF: predicated region fallthrough
CT: control target
= control target key end

     0   :  { %10 = vsyncpa [#allocation3], 0  ;;  %s883_s0 = inlined_call_operand.vmem [shape: f32[9,3], index: 0, kind: input, shape index: {}]   ;;  %s884_s1 = inlined_call_operand.vmem [shape: f32[9,1], index: 1, kind: input, shape index: {}]   ;;  %s885_s2 = inlined_call_operand.vmem [shape: f32[9,9], index: 2, kind: input, shape index: {}]   ;;  %s886_s3 = inlined_call_operand.vmem [shape: f32[9,1], index: 3, kind: input, shape index: {}]   ;;  %s887_s4 = inlined_call_operand.vmem [shape: f32[3,300], index: 4, kind: input, shape index: {}]   ;;  %s888_s5 = inlined_call_operand.hbm [shape: f32[9,300], index: 5, kind: output, shape index: {}]  }
   0x1   :  { %12 = vsyncpa [#allocation3 + $0x1], 0  ;;  %s736_s18 = smov 0   ;;  %s738_s19 = smov 0  }
   0x2   :  { %s740_s20 = smov 0   ;;  %s742_s21 = smov 0  }
   0x3 LB: > { %s757_s22 = sadd.s32 4294967295, %s698_s21   ;;  %s556_s23 = sadd.s32 4294967294, %s698_s21   ;;  %s698_s21 = sphi %s742_s21, %s894_s21   ;;  %s694_s20 = sphi %s740_s20, %s893_s20   ;;  %s690_s19 = sphi %s738_s19, %s892_s19   ;;  %s686_s18 = sphi %s736_s18, %s891_s18  }
   0x4   : > { %s761_s24 = sadd.s32 1, %s698_s21   ;;  %s135_s25 = sadd.s32 1, %s694_s20 }
   0x5   : > { %s132_s26 = ssub.s32 %s698_s21, %s761_s24  ;;  %p145_p0 = scmp.ne.s32.totalorder %s694_s20, %s690_s19 }
   0x6   : > { %p133_p1 = scmp.eq.s32.totalorder %s132_s26, 0  ;;  %p146_p2 = scmp.eq.s32.totalorder %s757_s22, 1 }
   0x7   : > { %p151_p3 = scmp.ne.s32.totalorder %s690_s19, %s686_s18  ;;  %p152_p4 = scmp.eq.s32.totalorder %s556_s23, 1 }
   0x8   : > { %s772_s27 = scalar_select %p133_p1, %s694_s20, %s135_s25  }
   0x9   : > { %p774_p5 = por %p146_p2, %p145_p0  ;;  %p778_p6 = por %p152_p4, %p151_p3 }
   0xa   : > { %p559_p7 = scmp.ge.s32.totalorder %s698_s21, 1  ;;  %p199_p8 = scmp.lt.s32.totalorder %s698_s21, 3 }
   0xc   : > { %p200_p9 = pnand %p559_p7, %p199_p8 }
   0xd   : > { %s785_s30 = sshll.u32 (!%p200_p9), %s757_s22, 1  ;;  %v700_v0 = vmov (!%p200_p9), 0.0   ;;  %v701_v1 = vmov (!%p200_p9), 0   ;;  %v253_v2 = vld [vmem:[%s884_s1] sm:$0xff] (!%p200_p9)  ;;  %v254_v3 = vld [vmem:[%s884_s1 + $0x8] sm:$0x1] (!%p200_p9) }
   0xe   : > { %203 = sbr.rel (%p200_p9) target bundleno = 508 (0x1fc), region = 40  ;;  %p236_p10 = scmp.lt.s32.totalorder (!%p200_p9), %s785_s30, 2  ;;  %343 = vmatprep.mubr.f32.mxu0 (!%p200_p9), %v700_v0  ;;  %633 = vset.pattern.permute.xlu0 (!%p200_p9), %v701_v1  ;;  %vm274_vm0 = vcmask (!%p200_p9), 1042432   ;;  %v251_v6 = vld [vmem:[%s883_s0] sm:$0xff] (!%p200_p9)  ;;  %vm267_vm1 = vcmask (!%p200_p9), 23552   ;;  %vm381_vm2 = vcmask (!%p200_p9), 1040384  }
   0xf   : > { %257 = vperm.xlu0 (!%p200_p9), %633, %v253_v2   ;;  %452 = vmatprep.mubr.f32.mxu1 (!%p200_p9), %v700_v0  ;;  %v252_v7 = vld [vmem:[%s883_s0 + $0x8] sm:$0x1] (!%p200_p9)  ;;  %v362_v8 = vld [vmem:[%s886_s3] sm:$0xff] (!%p200_p9)  ;;  %vm702_vm3 = vmmov (!%p200_p9), 1   ;;  %vm374_vm5 = vcmask (!%p200_p9), 72704   ;;  %s228_s12 = sand.u32 (!%p200_p9), 1, %s690_s19  }
  0x10   : > { %634 = vset.pattern.permute.xlu1 (!%p200_p9), %v701_v1  ;;  %v363_v9 = vld [vmem:[%s886_s3 + $0x8] sm:$0x1] (!%p200_p9)  ;;  %vm585_vm4 = vmpackc.low (!%p200_p9), %vm381_vm2, %vm702_vm3  ;;  %v360_v26 = vld [vmem:[%s885_s2] sm:$0xff] (!%p200_p9)  ;;  %s560_s13 = sshll.u32 (!%p200_p9), %s228_s12, 5  ;;  %s817_s15 = scalar_lea.sflag (!%p200_p9), [#allocation3], %s228_s12 }
  0x11   : > { %366 = vperm.xlu1 (!%p200_p9), %634, %v362_v8   ;;  %v361_v27 = vld [vmem:[%s885_s2 + $0x8] sm:$0x1] (!%p200_p9) }
  0x13   : > { %262 = vperm.xlu0 (!%p200_p9), %633, %v254_v3  }
  0x15   : > { %s237_s8 = scalar_select %p236_p10, %s785_s30, 2  ;;  %371 = vperm.xlu1 %634, %v363_v9  }
  0x16   : > { %s482_s16 = ssub.s32 (%p774_p5), 3, %s785_s30 }
  0x17   : > { %s562_s11 = sshll.u32 %s237_s8, 2  ;;  %p483_p11 = scmp.lt.s32.totalorder (%p774_p5), %s482_s16, 2 }
  0x18   : > { %s239_s14 = scalar_lea.vmem %s887_s4, %s562_s11 }
  0x19   : > { %v250_v4 = vld [vmem:[%s239_s14] sm:$0x77]  ;;  %s230_s14 = scalar_lea.vmem [#allocation2], %s560_s13 }
  0x1a   : > { %v266_v5 = vcombine.high %v250_v4, %v250_v4 }
  0x1c   : > { %563 = vmatprep.subr.msk.mxu0 %vm274_vm0, %v266_v5 }
  0x1d   : > { %564 = vmatpush1.msk.msra.mxu0 %vm274_vm0, %v250_v4 }
  0x1e   : > { %565 = vmatmul.mubr.msk.f32.vlgmr.msra.gmra.mrb[0].mxu0 %vm267_vm1, %v251_v6 }
  0x1f   : > { %349 = vmatprep.mubr.f32.mxu0 %v700_v0 }
  0x22   : > { %566 = vmatmul.mubr.msk.f32.gmra.mrb[2].mxu0 %vm267_vm1, %v252_v7 }
  0x8e   : > { %v258_v10 = vpop.permute.xlu0 %257 }
  0x90   : > { %v367_v28 = vpop.permute.xlu1 %366 }
  0x92   : > { %v263_v14 = vpop.permute.xlu0 %262 }
  0x94   : > { %v372_v34 = vpop.permute.xlu1 %371 }
  0xf1   : > { %v345_v11 = vpop.f32.mrb[0].mxu0 }
  0xf2   : > { %v347_v12 = vpop.f32.mrb[1].mxu0  ;;  %v346_v13 = vadd.f32 %v345_v11, %v258_v10 }
  0xf3   : > { %v348_v15 = vadd.f32 %v347_v12, %v258_v10 }
  0xf4   : > { %v356_v20 = vmax.f32 %v346_v13, 0.0 }
  0xf5   : > { %v351_v16 = vpop.f32.mrb[2].mxu0  ;;  %v357_v22 = vmax.f32 %v348_v15, 0.0 }
  0xf6   : > { %v352_v17 = vadd.f32 %v351_v16, %v263_v14  ;;  %v353_v18 = vpop.f32.mrb[3].mxu0 }
  0xf7   : > { %v354_v19 = vadd.f32 %v353_v18, %v263_v14 }
  0xf8   : > { %v358_v21 = vmax.f32 %v352_v17, 0.0 }
  0xf9   : > { %v359_v23 = vmax.f32 %v354_v19, 0.0 }
  0xfa   : > { %v587_v24 = vpack.c.bf16 %v358_v21, %v356_v20 }
  0xfb   : > { %v584_v25 = vpack.c.bf16 %v359_v23, %v357_v22 }
  0xfd   : > { %586 = vmatprep.subr.msk.bf16.mxu1 %vm585_vm4, %v584_v25 }
  0xfe   : > { %589 = vmatpush1.bf16.msk.msra.mxu1 %vm585_vm4, %v587_v24 }
 0x101   : > { %569 = vmatmul.mubr.msk.f32.vlgmr.msra.gmra.mrb[0].mxu1 %vm374_vm5, %v360_v26 }
 0x102   : > { %458 = vmatprep.mubr.f32.mxu1 %v700_v0 }
 0x105   : > { %570 = vmatmul.mubr.msk.f32.gmra.mrb[2].mxu1 %vm374_vm5, %v361_v27 }
 0x1d4   : > { %v454_v29 = vpop.f32.mrb[0].mxu1 }
 0x1d5   : > { %v455_v30 = vadd.f32 %v454_v29, %v367_v28  ;;  %v456_v31 = vpop.f32.mrb[1].mxu1 }
 0x1d6   : > { %v457_v32 = vadd.f32 %v456_v31, %v367_v28 }
 0x1d7   : > { %v465_v33 = vmax.f32 %v455_v30, 0.0 }
 0x1d8   : > { %v466_v35 = vmax.f32 %v457_v32, 0.0  ;;  %v460_v36 = vpop.f32.mrb[2].mxu1  ;;  %480 = sbr.rel (!%p774_p5) target bundleno = 508 (0x1fc), region = 44 }
 0x1d9   : > { %469 = vst [vmem:[%s230_s14] sm:$0xff] %v465_v33  ;;  %v461_v37 = vadd.f32 %v460_v36, %v372_v34  ;;  %v462_v38 = vpop.f32.mrb[3].mxu1 }
 0x1da   : > { %470 = vst [vmem:[%s230_s14 + $0x8] sm:$0xff] %v466_v35  ;;  %v463_v39 = vadd.f32 %v462_v38, %v372_v34 }
 0x1db   : > { %v467_v40 = vmax.f32 %v461_v37, 0.0 }
 0x1dc   : > { %v468_v41 = vmax.f32 %v463_v39, 0.0 }
 0x1dd   : > { %471 = vst [vmem:[%s230_s14 + $0x10] sm:$0x1] %v467_v40 }
 0x1de   : > { %472 = vst [vmem:[%s230_s14 + $0x18] sm:$0x1] %v468_v41 }
 0x1df   : > { %s896_s16 = smov (!%p483_p11, %s482_s16), 2 }
 0x1e0   : > { %s825_s17 = sshll.u32 %s896_s16, 8 }
 0x1e1   : > { %s487_s23 = ssub.s32 512, %s825_s17 }
 0x1e2   : > { %488 = vsyncadd %s817_s15, %s487_s23  ;;  %p574_p12 = scmp.ne.s32.totalorder %s825_s17, 0  ;;  %s581_s28 = sshll.u32 %s757_s22, 8 }
 0x1e3   : > { %s834_s30 = scalar_lea.hbm %s888_s5, %s581_s28  ;;  %s576_s6 = sshll.u32 %s896_s16, 3 }
 0x1e4   : > { %s494_s7 = sshll.u32 %s230_s14, 4  ;;  %s703_s9 = smov [#allocation2]   ;;  %s837_s7 = int_to_ptr.vmem [resolvable:$true] %s494_s7 }
 0x1e5   : > { %s636_s8 = scalar_lea.vmem %s837_s7, %s825_s17  ;;  %s640_s10 = sshll.u32 %s703_s9, 4  ;;  %s641_s10 = int_to_ptr.vmem [resolvable:$false] %s640_s10 }
 0x1e6   : > { %p637_p13 = scmp.ne.s32.totalorder %s837_s7, %s636_s8  ;;  %s642_s22 = scalar_lea.vmem %s641_s10, 1024 }
 0x1e7   : > { %p643_p2 = scmp.lt.s32.totalorder %s837_s7, %s641_s10  ;;  %p644_p3 = scmp.lt.s32.totalorder %s642_s22, %s636_s8 }
 0x1e8   : > { %p638_p0 = pnand %p637_p13, %p574_p12 }
 0x1e9   : > { %p645_p4 = por %p644_p3, %p643_p2 }
 0x1ea   : > { %p639_p1 = pneg %p638_p0 }
 0x1ec   : > { %p646_p5 = pnand %p645_p4, %p639_p1 }
 0x1ee   : > { %649 = shalt.err (!%p646_p5)
}
 0x1ef   : > { %s650_s11 = scalar_lea.hbm %s834_s30, %s825_s17  ;;  %s654_s14 = scalar_lea.hbm %s888_s5, 768 }
 0x1f0   : > { %p651_p7 = scmp.ne.s32.totalorder %s834_s30, %s650_s11  ;;  %p655_p10 = scmp.lt.u32.totalorder %s834_s30, %s888_s5 }
 0x1f1   : > { %p656_p11 = scmp.lt.u32.totalorder %s654_s14, %s650_s11  ;;  %p658_p0 = scmp.lt.u32.totalorder %s650_s11, %s834_s30 }
 0x1f2   : > { %p652_p8 = pnand %p651_p7, %p574_p12 }
 0x1f3   : > { %p657_p13 = por %p656_p11, %p655_p10 }
 0x1f4   : > { %p653_p9 = pneg %p652_p8 }
 0x1f5   : > { %p659_p1 = por %p658_p0, %p657_p13 }
 0x1f7   : > { %p660_p2 = pnand %p659_p1, %p653_p9 }
 0x1f9   : > { %663 = shalt.err (!%p660_p2)
}
 0x1fa   : > { %s704_s25 = smov 256   ;;  %s705_s26 = smov 384  }
 0x1fb   : > { %500 = dma.vmem_to_hbm [thread:$0]  (%p574_p12), %s837_s7, %s825_s17, %s834_s30, %s817_s15, %s704_s25, %s705_s26, %s576_s6  }
 0x1fc PF: > { %p595_p3 = scmp.ge.s32.totalorder %s698_s21, 2  ;;  %s509_s8 = sand.u32 1, %s686_s18  }
 0x1fd   : > { %s510_s9 = scalar_lea.sflag [#allocation3], %s509_s8 }
 0x1fe   : > { %p592_p4 = pnand %p595_p3, %p778_p6 }
 0x200   : > { %681 = dma.done.wait (!%p592_p4), %s510_s9, 512  }
 0x201   : > { %683 = vsyncadd (!%p592_p4), %s510_s9, 4294966784  ;;  %p15_p5 = scmp.ge.s32.totalorder %s761_s24, 4   ;;  %s891_s18 = smov %s690_s19 }
 0x202   : > { %s892_s19 = smov %s694_s20  ;;  %s893_s20 = smov %s772_s27 }
 0x203   : > { %s894_s21 = smov %s761_s24  ;;  %17 = sbr.rel (!%p15_p5) target bundleno = 3 (0x3), region = 75 }
 0x20a   :  { %515 = vsyncpa [#allocation3], 1 }
 0x20b   :  { %517 = vsyncpa [#allocation3 + $0x1], 1 }

</bundles_post_ra>
